<compile_context>
chip_gen: v7x
topology: tpu7x:2x2x1
jax: 0.10.0
libtpu: 0.0.40
codegen_flags: <defaults>
</compile_context>

<pallas_src>
import jax
import jax.numpy as jnp
from jax.experimental import pallas as pl
from jax.experimental.pallas import tpu as pltpu

EPS = 1e-6  # F.pairwise_distance default eps (added to the elementwise difference, as PyTorch does)


def _round_up(x, m):
    return ((x + m - 1) // m) * m


def _plan(batch, feat, itemsize, block_b=None):
    """Pick the batch tile (rows) and an explicit scoped-VMEM limit.

    The tile is sized by bytes against a budget derived from the part's VMEM
    capacity (capped at 40 MiB so the same plan fits v7x's 64 MiB physical VMEM
    with headroom), counting 2 input streams x 2 pipeline buffers at the lane-
    padded width plus the lane-padded (tb, 1) f32 label buffers.
    """
    try:
        cap = int(pltpu.get_tpu_info().vmem_capacity_bytes)
    except Exception:
        cap = 64 << 20  # assume the smallest (v7x-class) part if we cannot query

    budget = min(40 << 20, (cap * 5) // 8)
    d_pad = _round_up(feat, 128)
    # VMEM bytes held per batch row by the pipeline:
    #   2 inputs x 2 buffers x lane-padded row  +  2 buffers x lane-padded f32 label row
    per_row = 2 * 2 * d_pad * itemsize + 2 * 128 * 4

    if block_b is None:
        tb = (budget // per_row) // 32 * 32
    else:
        tb = _round_up(int(block_b), 32)
    tb = max(32, min(tb, _round_up(batch, 32), 32768))

    footprint = tb * per_row + (64 << 10)  # + output blocks / internal slack
    vmem_limit = max(16 << 20, footprint + (4 << 20))
    vmem_limit = min(vmem_limit, max(cap - (8 << 20), footprint + (1 << 20)))
    return tb, int(vmem_limit)


def contrastive_loss(output1, output2, label, margin=0.2, block_b=None):
    """Contrastive loss computed with a batch-tiled, fully parallel Pallas TPU kernel.

    output1, output2: (B, D) float arrays (f32 or bf16; upcast to f32 in-kernel)
    label:            (B,)   array (0 = similar pair, 1 = dissimilar pair)
    returns scalar float32 loss
    """
    B, D = output1.shape
    itemsize = jnp.dtype(output1.dtype).itemsize
    tb, vmem_limit = _plan(B, D, itemsize, block_b)
    grid = pl.cdiv(B, tb)
    rem = B - (grid - 1) * tb          # valid rows in the last (possibly partial) tile
    inv_b = 1.0 / float(B)             # fold the mean into one constant multiply
    margin = float(margin)

    lbl = label.reshape(B, 1).astype(jnp.float32)

    def kernel(o1_ref, o2_ref, lbl_ref, out_ref):
        o1 = o1_ref[...].astype(jnp.float32)       # bf16-friendly: upcast in-kernel
        o2 = o2_ref[...].astype(jnp.float32)
        lab = lbl_ref[...]                         # (tb, 1) f32, never widened to (tb, D)

        diff = o1 - o2 + EPS                                    # eps as in torch.pairwise_distance
        dist_sq = jnp.sum(diff * diff, axis=1, keepdims=True)   # (tb, 1)
        dist = jnp.sqrt(dist_sq)
        hinge = jnp.maximum(margin - dist, 0.0)                 # relu(margin - d)
        per_row = (1.0 - lab) * dist_sq + lab * (hinge * hinge)  # (tb, 1)

        def _store(rows):
            out_ref[...] = jnp.sum(rows).reshape(1, 1, 1)

        if rem == tb:
            # Every tile is full: no mask code emitted at all.
            _store(per_row)
        else:
            i = pl.program_id(0)
            last = pl.num_programs(0) - 1

            @pl.when(i != last)
            def _full():
                _store(per_row)

            @pl.when(i == last)
            def _partial():
                # Select (not arithmetic) so padded-row NaN/Inf cannot leak.
                row = jax.lax.broadcasted_iota(jnp.int32, per_row.shape, 0)
                _store(jnp.where(row < rem, per_row, 0.0))

    partials = pl.pallas_call(
        kernel,
        out_shape=jax.ShapeDtypeStruct((grid, 1, 1), jnp.float32),
        grid=(grid,),
        in_specs=[
            pl.BlockSpec((tb, D), lambda i: (i, 0)),
            pl.BlockSpec((tb, D), lambda i: (i, 0)),
            pl.BlockSpec((tb, 1), lambda i: (i, 0)),
        ],
        out_specs=pl.BlockSpec((1, 1, 1), lambda i: (i, 0, 0)),
        compiler_params=pltpu.CompilerParams(
            # Per-tile independent partial sums => batch axis can shard across
            # TensorCores (2x on v7x); harmless on single-TC v5e/v6e.
            dimension_semantics=("parallel",),
            vmem_limit_bytes=vmem_limit,
        ),
    )(output1, output2, lbl)

    return jnp.sum(partials) * inv_b


def _reference(output1, output2, label, margin=0.2):
    # Pure-JAX reference matching torch.nn.functional.pairwise_distance semantics.
    diff = output1.astype(jnp.float32) - output2.astype(jnp.float32) + EPS
    dist = jnp.sqrt(jnp.sum(diff * diff, axis=1))
    loss = (1.0 - label) * dist**2 + label * jnp.maximum(margin - dist, 0.0) ** 2
    return jnp.mean(loss)


if __name__ == "__main__":
    key = jax.random.PRNGKey(0)
    k1, k2, k3 = jax.random.split(key, 3)

    # Case 1: small batch, auto-sized tile (single grid step, masked partial tile).
    B, D = 20, 32
    o1 = jax.random.normal(k1, (B, D), dtype=jnp.float32)
    o2 = jax.random.normal(k2, (B, D), dtype=jnp.float32)
    lab = jax.random.bernoulli(k3, 0.5, (B,)).astype(jnp.float32)
    loss = contrastive_loss(o1, o2, lab, margin=0.2)
    jax.block_until_ready(loss)
    ref = _reference(o1, o2, lab, margin=0.2)
    assert jnp.allclose(loss, ref, rtol=1e-5, atol=1e-4), (loss, ref)

    # Case 2: multi-step "parallel" grid with a masked partial last tile.
    B2 = 300
    o1b = jax.random.normal(k1, (B2, D), dtype=jnp.float32)
    o2b = jax.random.normal(k2, (B2, D), dtype=jnp.float32)
    labb = jax.random.bernoulli(k3, 0.5, (B2,)).astype(jnp.float32)
    loss2 = contrastive_loss(o1b, o2b, labb, margin=0.2, block_b=64)  # grid=5, rem=44
    jax.block_until_ready(loss2)
    ref2 = _reference(o1b, o2b, labb, margin=0.2)
    assert jnp.allclose(loss2, ref2, rtol=1e-5, atol=1e-4), (loss2, ref2)

    # Case 3: exact multiple of the tile => mask-free fast path.
    loss3 = contrastive_loss(o1b[:256], o2b[:256], labb[:256], margin=0.2, block_b=64)  # grid=4, rem=tb
    jax.block_until_ready(loss3)
    ref3 = _reference(o1b[:256], o2b[:256], labb[:256], margin=0.2)
    assert jnp.allclose(loss3, ref3, rtol=1e-5, atol=1e-4), (loss3, ref3)

    # Case 4: bf16 activations (half the HBM bytes); in-kernel upcast keeps math in f32.
    loss4 = contrastive_loss(o1b.astype(jnp.bfloat16), o2b.astype(jnp.bfloat16), labb, margin=0.2)
    jax.block_until_ready(loss4)
    ref4 = _reference(o1b.astype(jnp.bfloat16), o2b.astype(jnp.bfloat16), labb, margin=0.2)
    assert jnp.allclose(loss4, ref4, rtol=1e-3, atol=1e-3), (loss4, ref4)

    print("KERNEL_OK")
</pallas_src>

<mosaic_0001>
module attributes {stable_mosaic.version = 11 : i64} {
  func.func @kernel(%arg0: i32, %arg1: memref<32x32xf32, #tpu.memory_space<vmem>>, %arg2: memref<32x32xf32, #tpu.memory_space<vmem>>, %arg3: memref<32x1xf32, #tpu.memory_space<vmem>>, %arg4: memref<1x1x1xf32, #tpu.memory_space<vmem>>) attributes {dimension_semantics = [#tpu.dimension_semantics<parallel>], iteration_bounds = array<i64: 1>, scalar_prefetch = 0 : i64, scratch_operands = 0 : i64, tpu.core_type = #tpu.core_type<tc>, window_params = [{transform_indices = @transform_0, window_bounds = array<i64: 32, 32>}, {transform_indices = @transform_1, window_bounds = array<i64: 32, 32>}, {transform_indices = @transform_2, window_bounds = array<i64: 32, 1>}, {transform_indices = @transform_3, window_bounds = array<i64: 1, 1, 1>}]} {
    %c0 = arith.constant 0 : index
    %c0_0 = arith.constant 0 : index
    %0 = vector.load %arg1[%c0, %c0_0] : memref<32x32xf32, #tpu.memory_space<vmem>>, vector<32x32xf32>
    %c0_1 = arith.constant 0 : index
    %c0_2 = arith.constant 0 : index
    %1 = vector.load %arg2[%c0_1, %c0_2] : memref<32x32xf32, #tpu.memory_space<vmem>>, vector<32x32xf32>
    %c0_3 = arith.constant 0 : index
    %c0_4 = arith.constant 0 : index
    %2 = vector.load %arg3[%c0_3, %c0_4] : memref<32x1xf32, #tpu.memory_space<vmem>>, vector<32x1xf32>
    %3 = arith.subf %0, %1 : vector<32x32xf32>
    %cst = arith.constant 9.99999997E-7 : f32
    %4 = vector.broadcast %cst : f32 to vector<32x32xf32>
    %5 = arith.addf %3, %4 : vector<32x32xf32>
    %6 = arith.mulf %5, %5 : vector<32x32xf32>
    %cst_5 = arith.constant dense<0.000000e+00> : vector<32xf32>
    %7 = vector.multi_reduction <add>, %6, %cst_5 [1] : vector<32x32xf32> to vector<32xf32>
    %8 = vector.shape_cast %7 : vector<32xf32> to vector<32x1xf32>
    %9 = math.sqrt %8 : vector<32x1xf32>
    %cst_6 = arith.constant 2.000000e-01 : f32
    %10 = vector.broadcast %cst_6 : f32 to vector<32x1xf32>
    %11 = arith.subf %10, %9 : vector<32x1xf32>
    %cst_7 = arith.constant 0.000000e+00 : f32
    %12 = vector.broadcast %cst_7 : f32 to vector<32x1xf32>
    %13 = arith.maximumf %11, %12 : vector<32x1xf32>
    %cst_8 = arith.constant 1.000000e+00 : f32
    %14 = vector.broadcast %cst_8 : f32 to vector<32x1xf32>
    %15 = arith.subf %14, %2 : vector<32x1xf32>
    %16 = arith.mulf %15, %8 : vector<32x1xf32>
    %17 = arith.mulf %13, %13 : vector<32x1xf32>
    %18 = arith.mulf %2, %17 : vector<32x1xf32>
    %19 = arith.addf %16, %18 : vector<32x1xf32>
    %c0_i32 = arith.constant 0 : i32
    %20 = arith.cmpi ne, %arg0, %c0_i32 : i32
    %21 = arith.extui %20 : i1 to i32
    %c0_i32_9 = arith.constant 0 : i32
    %22 = arith.cmpi ne, %21, %c0_i32_9 : i32
    scf.if %22 {
      %26 = vector.shape_cast %19 : vector<32x1xf32> to vector<1x32x1xf32>
      %cst_12 = arith.constant dense<0.000000e+00> : vector<1xf32>
      %27 = vector.multi_reduction <add>, %26, %cst_12 [1, 2] : vector<1x32x1xf32> to vector<1xf32>
      %28 = vector.shape_cast %27 : vector<1xf32> to vector<1x1x1xf32>
      %29 = vector.extract %28[0, 0, 0] : f32 from vector<1x1x1xf32>
      %30 = vector.broadcast %29 : f32 to vector<1x1x1xf32>
      %c0_13 = arith.constant 0 : index
      %c0_14 = arith.constant 0 : index
      %c0_15 = arith.constant 0 : index
      %31 = vector.load %arg4[%c0_13, %c0_14, %c0_15] : memref<1x1x1xf32, #tpu.memory_space<vmem>>, vector<1x1x1xf32>
      tpu.vector_store %arg4[%c0_13, %c0_14, %c0_15], %30 {strides = array<i32>} : memref<1x1x1xf32, #tpu.memory_space<vmem>>, vector<1x1x1xf32>,
    } else {
    }
    %c0_i32_10 = arith.constant 0 : i32
    %23 = arith.cmpi eq, %arg0, %c0_i32_10 : i32
    %24 = arith.extui %23 : i1 to i32
    %c0_i32_11 = arith.constant 0 : i32
    %25 = arith.cmpi ne, %24, %c0_i32_11 : i32
    scf.if %25 {
      %26 = tpu.iota {dimensions = array<i32: 0>} : vector<32x1xi32>
      %c20_i32 = arith.constant 20 : i32
      %27 = vector.broadcast %c20_i32 : i32 to vector<32x1xi32>
      %28 = arith.cmpi slt, %26, %27 : vector<32x1xi32>
      %cst_12 = arith.constant 0.000000e+00 : f32
      %29 = vector.broadcast %cst_12 : f32 to vector<32x1xf32>
      %30 = arith.select %28, %19, %29 : vector<32x1xi1>, vector<32x1xf32>
      %31 = vector.shape_cast %30 : vector<32x1xf32> to vector<1x32x1xf32>
      %cst_13 = arith.constant dense<0.000000e+00> : vector<1xf32>
      %32 = vector.multi_reduction <add>, %31, %cst_13 [1, 2] : vector<1x32x1xf32> to vector<1xf32>
      %33 = vector.shape_cast %32 : vector<1xf32> to vector<1x1x1xf32>
      %34 = vector.extract %33[0, 0, 0] : f32 from vector<1x1x1xf32>
      %35 = vector.broadcast %34 : f32 to vector<1x1x1xf32>
      %c0_14 = arith.constant 0 : index
      %c0_15 = arith.constant 0 : index
      %c0_16 = arith.constant 0 : index
      %36 = vector.load %arg4[%c0_14, %c0_15, %c0_16] : memref<1x1x1xf32, #tpu.memory_space<vmem>>, vector<1x1x1xf32>
      tpu.vector_store %arg4[%c0_14, %c0_15, %c0_16], %35 {strides = array<i32>} : memref<1x1x1xf32, #tpu.memory_space<vmem>>, vector<1x1x1xf32>,
    } else {
    }
    return
  }
  func.func @transform_0(%arg0: i32) -> (i32, i32) {
    %c0_i32 = arith.constant 0 : i32
    %c0_i32_0 = arith.constant 0 : i32
    return %arg0, %c0_i32 : i32, i32
  }
  func.func @transform_1(%arg0: i32) -> (i32, i32) {
    %c0_i32 = arith.constant 0 : i32
    %c0_i32_0 = arith.constant 0 : i32
    return %arg0, %c0_i32 : i32, i32
  }
  func.func @transform_2(%arg0: i32) -> (i32, i32) {
    %c0_i32 = arith.constant 0 : i32
    %c0_i32_0 = arith.constant 0 : i32
    return %arg0, %c0_i32 : i32, i32
  }
  func.func @transform_3(%arg0: i32) -> (i32, i32, i32) {
    %c0_i32 = arith.constant 0 : i32
    %c0_i32_0 = arith.constant 0 : i32
    %c0_i32_1 = arith.constant 0 : i32
    return %arg0, %c0_i32, %c0_i32_0 : i32, i32, i32
  }
}

</mosaic_0001>

<bundles_post_ra>
// kernel: tpu_custom_call.1
= control target key start
LH: loop header
LB: loop body
LE: loop exit
PB: predicated region body
PF: predicated region fallthrough
CT: control target
= control target key end

     0   :  { %8 = vsyncpa [#allocation3], 0  ;;  %s324_s0 = inlined_call_operand.vmem [shape: f32[20,32], index: 0, kind: input, shape index: {}]   ;;  %s325_s1 = inlined_call_operand.hbm [shape: f32[20,32], index: 1, kind: input, shape index: {}]   ;;  %s326_s2 = inlined_call_operand.vmem [shape: f32[20,1], index: 2, kind: input, shape index: {}]   ;;  %s327_s3 = inlined_call_operand.hbm [shape: f32[1,1,1], index: 3, kind: output, shape index: {}]  }
   0x1   :  { %9 = vsyncpa [#allocation4], 0 }
   0x2   :  { %16 = vsyncadd [#allocation3], 128  ;;  %s258_s12 = smov [#allocation2]   ;;  %s210_s16 = scalar_lea.hbm %s325_s1, 384 }
   0x3   :  { %s17_s13 = sshll.u32 %s258_s12, 4  ;;  %p211_p0 = scmp.ne.s32.totalorder %s325_s1, %s210_s16  ;;  %s18_s13 = int_to_ptr.vmem [resolvable:$true] %s17_s13 }
   0x4   :  { %p214_p1 = scmp.lt.u32.totalorder %s210_s16, %s325_s1 }
   0x6   :  { %p216_p2 = pnand %p214_p1, %p211_p0 }
   0x8   :  { %219 = shalt.err (!%p216_p2)
}
   0x9   :  { %s220_s21 = scalar_lea.vmem %s18_s13, 384  ;;  %s224_s22 = scalar_lea.vmem %s18_s13, 512 }
   0xa   :  { %p221_p3 = scmp.ne.s32.totalorder %s18_s13, %s220_s21  ;;  %p225_p4 = scmp.lt.s32.totalorder %s18_s13, %s18_s13 }
   0xb   :  { %p226_p5 = scmp.lt.s32.totalorder %s224_s22, %s220_s21 }
   0xd   :  { %p227_p6 = por %p226_p5, %p225_p4 }
   0xf   :  { %p228_p7 = pnand %p227_p6, %p221_p3 }
  0x11   :  { %231 = shalt.err (!%p228_p7)
}
  0x12   :  { %s259_s23 = smov 128   ;;  %s260_s24 = smov 8  }
  0x13   :  { %23 = dma.hbm_to_vmem [thread:$0]  %s325_s1, 384, %s18_s13, [#allocation3], %s259_s23, %s259_s23, %s260_s24  }
  0x14   :  { %254 = dma.done.wait [#allocation3], 512  }
  0x15   :  { %255 = vsyncadd [#allocation3], 4294966784  ;;  %v31_v0 = vld [vmem:[%s324_s0 + $0x10] sm:$0xff]  ;;  %v29_v2 = vld [vmem:[%s324_s0] sm:$0xff]  ;;  %vm53_vm0 = vcmask 261120   ;;  %v150_v30 = vlaneseq  ;;  %vm163_vm8 = vcmask 7168  }
  0x16   :  { %v35_v1 = vld [vmem:[#allocation2 + $0x10] sm:$0xff]  ;;  %v33_v4 = vld [vmem:[#allocation2] sm:$0xff]  ;;  %v30_v5 = vld [vmem:[%s324_s0 + $0x8] sm:$0xff]  ;;  %vm181_vm9 = vcmask 0  }
  0x17   :  { %v43_v3 = vsub.f32 %v31_v0, %v35_v1  ;;  %v34_v6 = vld [vmem:[#allocation2 + $0x8] sm:$0xff]  ;;  %v41_v7 = vsub.f32 %v29_v2, %v33_v4  ;;  %v39_v35 = vld [vmem:[%s326_s2 + $0x10] sm:$0xff]  ;;  %v37_v38 = vld [vmem:[%s326_s2] sm:$0xff]  ;;  %v151_v42 = vshrl.u32 %v150_v30, 7 }
  0x18   :  { %v42_v8 = vsub.f32 %v30_v5, %v34_v6  ;;  %v38_v43 = vld [vmem:[%s326_s2 + $0x8] sm:$0xff]  ;;  %v104_v45 = vsub.f32 1.0, %v39_v35  ;;  %v102_v48 = vsub.f32 1.0, %v37_v38  ;;  %s261_s2 = smov [#allocation5]  }
  0x19   :  { %v47_v9 = vadd.f32 1e-06, %v43_v3  ;;  %v45_v10 = vadd.f32 1e-06, %v41_v7  ;;  %v103_v52 = vsub.f32 1.0, %v38_v43  ;;  %v153_v54 = vadd.s32 16, %v151_v42 }
  0x1a   :  { %v46_v11 = vadd.f32 1e-06, %v42_v8  ;;  %s189_s10 = sshll.u32 %s261_s2, 4  ;;  %s190_s10 = int_to_ptr.vmem [resolvable:$true] %s189_s10 }
  0x1b   :  { %v51_v12 = vmul.f32 %v47_v9, %v47_v9  ;;  %v49_v13 = vmul.f32 %v45_v10, %v45_v10  ;;  %vm157_vm7 = vcmp.lt.s32.totalorder %v153_v54, 20  ;;  %s232_s12 = scalar_lea.vmem %s190_s10, 16  ;;  %s236_s13 = scalar_lea.vmem %s190_s10, 32 }
  0x1c   :  { %v50_v14 = vmul.f32 %v46_v11, %v46_v11  ;;  %p233_p8 = scmp.ne.s32.totalorder %s190_s10, %s232_s12  ;;  %p237_p9 = scmp.lt.s32.totalorder %s190_s10, %s190_s10 }
  0x1d   :  { %v60_v15 = vsel %vm53_vm0, %v51_v12, 0.0  ;;  %v54_v16 = vsel %vm53_vm0, %v49_v13, 0.0  ;;  %p238_p10 = scmp.lt.s32.totalorder %s236_s13, %s232_s12 }
  0x1e   :  { %61 = vadd.xlane.f32.xlu1 %v60_v15  ;;  %55 = vadd.xlane.f32.xlu0 %v54_v16  ;;  %v57_v17 = vsel %vm53_vm0, %v50_v14, 0.0 }
  0x1f   :  { %p239_p11 = por %p238_p10, %p237_p9 }
  0x21   :  { %p240_p12 = pnand %p239_p11, %p233_p8 }
  0x22   :  { %58 = vadd.xlane.f32.xlu0 %v57_v17 }
  0xab   :  { %v62_v18 = vpop.xlane.xlu1 %61  ;;  %v56_v19 = vpop.xlane.xlu0 %55 }
  0xac   :  { %204 = vrsqrt.f32 %v62_v18  ;;  %vm82_vm1 = vcmp.eq.f32.partialorder %v62_v18, inf  ;;  %v85_v25 = vand.u32 2147483648, %v62_v18  ;;  %vm68_vm2 = vcmp.eq.f32.partialorder %v56_v19, inf }
  0xad   :  { %206 = vrsqrt.f32 %v56_v19  ;;  %v71_v26 = vand.u32 2147483648, %v56_v19  ;;  %vm84_vm3 = vcmp.eq.f32.partialorder %v62_v18, 0.0  ;;  %vm70_vm4 = vcmp.eq.f32.partialorder %v56_v19, 0.0 }
  0xae   :  { %v108_v55 = vmul.f32 %v104_v45, %v62_v18  ;;  %v106_v56 = vmul.f32 %v102_v48, %v56_v19 }
  0xaf   :  { %v59_v20 = vpop.xlane.xlu0 %58 }
  0xb0   :  { %208 = vrsqrt.f32 %v59_v20  ;;  %vm75_vm5 = vcmp.eq.f32.partialorder %v59_v20, inf  ;;  %v78_v37 = vand.u32 2147483648, %v59_v20  ;;  %vm77_vm6 = vcmp.eq.f32.partialorder %v59_v20, 0.0 }
  0xb1   :  { %v107_v59 = vmul.f32 %v103_v52, %v59_v20 }
  0xb6   :  { %v205_v21 = vpop.eup %204 }
  0xb7   :  { %v207_v22 = vpop.eup %206  ;;  %v81_v23 = vmul.f32 %v205_v21, %v62_v18 }
  0xb8   :  { %v67_v24 = vmul.f32 %v207_v22, %v56_v19 }
  0xb9   :  { %v83_v27 = vsel %vm82_vm1, %v62_v18, %v81_v23 }
  0xba   :  { %v69_v28 = vsel %vm68_vm2, %v56_v19, %v67_v24  ;;  %v86_v29 = vsel %vm84_vm3, %v85_v25, %v83_v27  ;;  %v209_v31 = vpop.eup %208 }
  0xbb   :  { %v72_v32 = vsel %vm70_vm4, %v71_v26, %v69_v28  ;;  %v96_v33 = vsub.f32 0.2, %v86_v29  ;;  %v74_v34 = vmul.f32 %v209_v31, %v59_v20 }
  0xbc   :  { %v94_v36 = vsub.f32 0.2, %v72_v32 }
  0xbd   :  { %v100_v39 = vmax.f32 %v96_v33, 0.0  ;;  %v76_v40 = vsel %vm75_vm5, %v59_v20, %v74_v34 }
  0xbe   :  { %v98_v41 = vmax.f32 %v94_v36, 0.0  ;;  %v79_v44 = vsel %vm77_vm6, %v78_v37, %v76_v40 }
  0xbf   :  { %v112_v46 = vmul.f32 %v100_v39, %v100_v39  ;;  %v95_v47 = vsub.f32 0.2, %v79_v44 }
  0xc0   :  { %v110_v49 = vmul.f32 %v98_v41, %v98_v41 }
  0xc1   :  { %v116_v50 = vmul.f32 %v112_v46, %v39_v35  ;;  %v99_v51 = vmax.f32 %v95_v47, 0.0 }
  0xc2   :  { %v114_v53 = vmul.f32 %v110_v49, %v37_v38 }
  0xc3   :  { %v111_v57 = vmul.f32 %v99_v51, %v99_v51  ;;  %v120_v58 = vadd.f32 %v116_v50, %v108_v55 }
  0xc4   :  { %v118_v61 = vadd.f32 %v114_v53, %v106_v56 }
  0xc5   :  { %v115_v60 = vmul.f32 %v111_v57, %v38_v43  ;;  %v161_v63 = vsel %vm157_vm7, %v120_v58, 0.0 }
  0xc6   :  { %v164_v0 = vsel %vm163_vm8, %v118_v61, 0.0  ;;  %v167_v3 = vsel %vm163_vm8, %v161_v63, 0.0 }
  0xc7   :  { %v119_v62 = vadd.f32 %v115_v60, %v107_v59 }
  0xc9   :  { %v165_v1 = vsel %vm163_vm8, %v119_v62, 0.0 }
  0xca   :  { %v166_v2 = vadd.f32 %v165_v1, %v164_v0 }
  0xcc   :  { %v168_v4 = vadd.f32 %v167_v3, %v166_v2 }
  0xce   :  { %171 = vadd.xlane.f32.xlu1 %v168_v4 }
 0x15b   :  { %v172_v5 = vpop.xlane.xlu1 %171 }
 0x15c   :  { %v173_v6 = vrot.slane %v172_v5, 4 }
 0x15e   :  { %v174_v7 = vadd.f32 %v173_v6, %v172_v5 }
 0x160   :  { %v175_v8 = vrot.slane %v174_v7, 2 }
 0x162   :  { %v176_v9 = vadd.f32 %v175_v8, %v174_v7 }
 0x164   :  { %v177_v10 = vrot.slane %v176_v9, 1 }
 0x166   :  { %v178_v11 = vadd.f32 %v177_v10, %v176_v9 }
 0x168   :  { %198 = vpush %v178_v11 }
 0x199   :  { %s199_s11 = spop %198 }
 0x19a   :  { %v180_v12 = vstv %s199_s11 }
 0x19b   :  { %182 = vst.msk [vmem:[#allocation5] sm:$0x1] %vm181_vm9, %v180_v12 }
 0x19c   :  { %243 = shalt.err (!%p240_p12)
}
 0x19d   :  { %s244_s16 = scalar_lea.hbm %s327_s3, 16 }
 0x19e   :  { %p245_p13 = scmp.ne.s32.totalorder %s327_s3, %s244_s16  ;;  %p248_p0 = scmp.lt.u32.totalorder %s244_s16, %s327_s3 }
 0x1a0   :  { %p250_p1 = pnand %p248_p0, %p245_p13 }
 0x1a2   :  { %253 = shalt.err (!%p250_p1)
}
 0x1a3   :  { %192 = dma.vmem_to_hbm [thread:$0]  %s190_s10, 16, %s327_s3, [#allocation4]  }
 0x1a4   :  { %256 = dma.done.wait [#allocation4], 16  }
 0x1a5   :  { %257 = vsyncadd [#allocation4], 4294967280 }
 0x1a6   :  { %196 = vsyncpa [#allocation3], 1 }
 0x1a7   :  { %197 = vsyncpa [#allocation4], 1 }

</bundles_post_ra>
